<compile_context>
chip_gen: v5e
topology: v5e:2x2
jax: 0.10.0
libtpu: 0.0.40
codegen_flags: <defaults>
</compile_context>

<pallas_src>
import math

import jax
import jax.numpy as jnp
from jax.experimental import pallas as pl
from jax.experimental.pallas import tpu as pltpu

# ----------------------------------------------------------------------------
# FX-chain configuration (mirrors ALL_PROCESSORS / num_params / param_range of
# the PyTorch module; param counts are fixed deterministically in-script).
# ----------------------------------------------------------------------------
ALL_PROCESSORS = ["eq", "distortion", "multiband_comp", "gain",
                  "limiter", "imager", "delay", "reverb"]
NUM_PARAMS = {"eq": 15, "distortion": 1, "multiband_comp": 16, "gain": 1,
              "limiter": 3, "imager": 1, "delay": 2, "reverb": 12}
FX_INDICES = {name: i for i, name in enumerate(ALL_PROCESSORS)}

PARAM_RANGE = []
_start = 0
for _name in ALL_PROCESSORS:
    PARAM_RANGE.append((_start, _start + NUM_PARAMS[_name]))
    _start += NUM_PARAMS[_name]
TOTAL_NUM_PARAMS = _start

_LOG10_OVER_20 = math.log(10.0) / 20.0   # dB -> linear via exp()
_NO_CLIP = 3.0e38                        # "no limiter" threshold (finite, >> any audio)

_SUBLANE = 8
_WIDE_LANE = 512                         # lane width for long clips
_NARROW_LANE = 128                       # lane width for short clips (keeps R >= 8 sooner)
_TARGET_TILE_BYTES = 4 * 1024 * 1024     # per VMEM buffer; in+out double-buffered ~16 MiB


def _ceil_div(a, b):
    return -(-a // b)


def _round_up(a, m):
    return _ceil_div(a, m) * m


def _choose_tiling(B, C, T, itemsize):
    """Lane-dense layout (B,C,T) -> (B,C,R,L); returns (L, T_pad, R, tile_r)."""
    L = _WIDE_LANE if T >= _SUBLANE * _WIDE_LANE else _NARROW_LANE
    T_pad = _round_up(T, L)
    R = T_pad // L
    rows_per_tile = max(
        _SUBLANE,
        (_TARGET_TILE_BYTES // (C * L * itemsize)) // _SUBLANE * _SUBLANE)
    if R <= rows_per_tile:
        tile_r = R                                   # full row axis (full-dim rule)
    else:
        n = _ceil_div(R, rows_per_tile)              # balanced split -> no tiny ragged tile
        tile_r = _round_up(_ceil_div(R, n), _SUBLANE)
    # v7x has 2 TensorCores: keep >= 4 grid blocks to shard across them when possible.
    while B * _ceil_div(R, tile_r) < 4 and tile_r > _SUBLANE:
        tile_r = max(_SUBLANE, (tile_r // 2) // _SUBLANE * _SUBLANE)
    return L, T_pad, R, tile_r


# ----------------------------------------------------------------------------
# Kernel: one (1, C, tile_r, L) block per grid step; exactly one full-tile store
# (two half-tile full-vreg stores on the imager branch).
# ----------------------------------------------------------------------------
def _make_fx_kernel(stereo):
    def _fx_kernel(is_dist_ref, is_img_ref, gain_ref, thr_ref, ca_ref, cb_ref,
                   x_ref, o_ref):
        b = pl.program_id(0)
        is_dist = is_dist_ref[b]

        @pl.when(is_dist != 0)
        def _():
            # distortion: tanh waveshaper with drive gain (EUP path, only when taken)
            g = gain_ref[b]
            o_ref[...] = jnp.tanh(x_ref[...].astype(jnp.float32) * g).astype(o_ref.dtype)

        if stereo:
            is_img = is_img_ref[b]

            @pl.when(is_img != 0)
            def _():
                # mid/side imager: out_L = ca*L + cb*R, out_R = ca*R + cb*L,
                # with ca = 0.5*(1+w), cb = 0.5*(1-w); channel swap by slab indexing
                # (no sublane roll), each store is a full (tile_r, L) slab.
                ca = ca_ref[b]
                cb = cb_ref[b]
                xl = x_ref[0, 0].astype(jnp.float32)
                xr = x_ref[0, 1].astype(jnp.float32)
                o_ref[0, 0] = (ca * xl + cb * xr).astype(o_ref.dtype)
                o_ref[0, 1] = (ca * xr + cb * xl).astype(o_ref.dtype)

            other = jnp.logical_and(is_dist == 0, is_img == 0)
        else:
            other = is_dist == 0

        @pl.when(other)
        def _():
            # gain / limiter static clip / pass-through, fused in one elementwise pass
            g = gain_ref[b]
            thr = thr_ref[b]
            y = jnp.clip(x_ref[...].astype(jnp.float32) * g, -thr, thr)
            o_ref[...] = y.astype(o_ref.dtype)

    return _fx_kernel


# ----------------------------------------------------------------------------
# Wrapper (mirrors Random_Single_FX_Chain.forward signature/returns).
# ----------------------------------------------------------------------------
def random_single_fx_chain(x, nn_param=None, activate=None, labels=None, key=None):
    B, C, T = x.shape
    if key is None:
        key = jax.random.PRNGKey(0)
    k_lbl, k_prm = jax.random.split(key)

    if labels is None:
        labels = jax.random.randint(k_lbl, (B,), 0, len(ALL_PROCESSORS), dtype=jnp.int32)
    else:
        labels = labels.astype(jnp.int32)
    if nn_param is None:
        nn_param = jax.random.uniform(k_prm, (B, TOTAL_NUM_PARAMS), dtype=jnp.float32)
    else:
        assert nn_param.shape == (B, TOTAL_NUM_PARAMS)
        nn_param = nn_param.astype(jnp.float32)
    if activate is None:
        activate = jax.nn.one_hot(labels, len(ALL_PROCESSORS), dtype=jnp.float32)

    # ---- fold each element's FX choice into a few fused scalar coefficients ----
    gs = PARAM_RANGE[FX_INDICES["gain"]][0]
    ds = PARAM_RANGE[FX_INDICES["distortion"]][0]
    ls = PARAM_RANGE[FX_INDICES["limiter"]][0]
    ims = PARAM_RANGE[FX_INDICES["imager"]][0]

    is_gain = labels == FX_INDICES["gain"]
    is_dist = labels == FX_INDICES["distortion"]
    is_lim = labels == FX_INDICES["limiter"]
    is_img = labels == FX_INDICES["imager"]

    gain_lin = jnp.exp((6.0 + nn_param[:, gs] * (12.0 - 6.0)) * _LOG10_OVER_20)
    drive_lin = jnp.exp((0.0 + nn_param[:, ds] * (8.0 - 0.0)) * _LOG10_OVER_20)
    thr_lin = jnp.exp((-20.0 + nn_param[:, ls] * ((0.0 - 1e-6) - (-20.0))) * _LOG10_OVER_20)
    width = nn_param[:, ims]

    g = jnp.where(is_gain, gain_lin,
                  jnp.where(is_dist, drive_lin, 1.0)).astype(jnp.float32)
    thr = jnp.where(is_lim, thr_lin, _NO_CLIP).astype(jnp.float32)
    if C == 2:
        ca = jnp.where(is_img, 0.5 * (1.0 + width), 1.0).astype(jnp.float32)
        cb = jnp.where(is_img, 0.5 * (1.0 - width), 0.0).astype(jnp.float32)
        is_img_i = is_img.astype(jnp.int32)
    else:
        # TODO(synk): mid/side imager is only defined for stereo; non-stereo inputs
        # fall back to pass-through for the imager label.
        ca = jnp.ones((B,), jnp.float32)
        cb = jnp.zeros((B,), jnp.float32)
        is_img_i = jnp.zeros((B,), jnp.int32)
    is_dist_i = is_dist.astype(jnp.int32)

    # eq / multiband_comp / delay / reverb labels keep passthrough coefficients
    # (g=1, thr=big, imager flag off).
    # TODO(synk): biquad IIR EQ, multiband compressor/expander ballistics, fractional
    # delay lines and reverb convolution have per-sample recurrences / long FFT conv
    # with no clean vectorized Pallas form; they remain pass-through here.
    # TODO(synk): limiter attack/release envelope (per-sample IIR) is not applied;
    # only the static hard-clip gain stage runs.

    # ---- lane-dense layout + tiling ----
    L, T_pad, R, tile_r = _choose_tiling(B, C, T, x.dtype.itemsize)
    x_in = x if T_pad == T else jnp.pad(x, ((0, 0), (0, 0), (0, T_pad - T)))
    x_r = x_in.reshape(B, C, R, L)

    grid = (B, _ceil_div(R, tile_r))
    blk = pl.BlockSpec((1, C, tile_r, L), lambda b, t, *_: (b, 0, t, 0))

    cost = pl.CostEstimate(
        flops=6 * x_r.size,
        transcendentals=x_r.size,                       # upper bound (tanh branch)
        bytes_accessed=2 * x_r.size * x_r.dtype.itemsize,
    )

    out_r = pl.pallas_call(
        _make_fx_kernel(C == 2),
        out_shape=jax.ShapeDtypeStruct(x_r.shape, x_r.dtype),
        grid_spec=pltpu.PrefetchScalarGridSpec(
            num_scalar_prefetch=6,              # is_dist, is_img, g, thr, ca, cb -> SMEM
            grid=grid,
            in_specs=[blk],                     # x tile
            out_specs=blk,
        ),
        input_output_aliases={6: 0},            # x (arg 6, after 6 prefetch args) -> out
        cost_estimate=cost,
        compiler_params=pltpu.CompilerParams(
            dimension_semantics=("parallel", "parallel"),
            vmem_limit_bytes=32 * 1024 * 1024,  # safe scoped budget on v5e/v6e/v7x
        ),
    )(is_dist_i, is_img_i, g, thr, ca, cb, x_r)

    x_processed = out_r.reshape(B, C, T_pad)
    if T_pad != T:
        x_processed = x_processed[:, :, :T]
    return x_processed, nn_param, activate, labels


if __name__ == "__main__":
    key = jax.random.PRNGKey(0)
    kx, kfx = jax.random.split(key)

    B, C, T = 4, 2, 1024                       # small stereo audio batch
    x = 0.1 * jax.random.normal(kx, (B, C, T), dtype=jnp.float32)

    # exercise every implemented compute branch: gain, distortion, limiter, imager
    labels = jnp.array([FX_INDICES["gain"], FX_INDICES["distortion"],
                        FX_INDICES["limiter"], FX_INDICES["imager"]], dtype=jnp.int32)

    out, nn_param, activate, labels = random_single_fx_chain(x, labels=labels, key=kfx)
    jax.block_until_ready(out)
    print("KERNEL_OK")
</pallas_src>

<mosaic_0001>
module attributes {stable_mosaic.version = 11 : i64} {
  func.func @_fx_kernel(%arg0: i32, %arg1: i32, %arg2: memref<4xi32, #tpu.memory_space<smem>>, %arg3: memref<4xi32, #tpu.memory_space<smem>>, %arg4: memref<4xf32, #tpu.memory_space<smem>>, %arg5: memref<4xf32, #tpu.memory_space<smem>>, %arg6: memref<4xf32, #tpu.memory_space<smem>>, %arg7: memref<4xf32, #tpu.memory_space<smem>>, %arg8: memref<1x2x8x128xf32, #tpu.memory_space<vmem>>, %arg9: memref<1x2x8x128xf32, #tpu.memory_space<vmem>>) attributes {dimension_semantics = [#tpu.dimension_semantics<parallel>, #tpu.dimension_semantics<parallel>], iteration_bounds = array<i64: 4, 1>, scalar_prefetch = 6 : i64, scratch_operands = 0 : i64, tpu.core_type = #tpu.core_type<tc>, window_params = [{transform_indices = @transform_0, window_bounds = array<i64: 1, 2, 8, 128>}, {transform_indices = @transform_1, window_bounds = array<i64: 1, 2, 8, 128>}]} {
    %0 = arith.index_cast %arg0 : i32 to index
    %1 = memref.load %arg2[%0] : memref<4xi32, #tpu.memory_space<smem>>
    %c0_i32 = arith.constant 0 : i32
    %2 = arith.cmpi ne, %1, %c0_i32 : i32
    %3 = arith.extui %2 : i1 to i32
    %c0_i32_0 = arith.constant 0 : i32
    %4 = arith.cmpi ne, %3, %c0_i32_0 : i32
    scf.if %4 {
      %15 = arith.index_cast %arg0 : i32 to index
      %16 = memref.load %arg4[%15] : memref<4xf32, #tpu.memory_space<smem>>
      %c0 = arith.constant 0 : index
      %c0_6 = arith.constant 0 : index
      %c0_7 = arith.constant 0 : index
      %c0_8 = arith.constant 0 : index
      %17 = vector.load %arg8[%c0, %c0_6, %c0_7, %c0_8] : memref<1x2x8x128xf32, #tpu.memory_space<vmem>>, vector<1x2x8x128xf32>
      %18 = vector.broadcast %16 : f32 to vector<1x2x8x128xf32>
      %19 = arith.mulf %17, %18 : vector<1x2x8x128xf32>
      %20 = math.tanh %19 : vector<1x2x8x128xf32>
      %c0_9 = arith.constant 0 : index
      %c0_10 = arith.constant 0 : index
      %c0_11 = arith.constant 0 : index
      %c0_12 = arith.constant 0 : index
      %21 = vector.load %arg9[%c0_9, %c0_10, %c0_11, %c0_12] : memref<1x2x8x128xf32, #tpu.memory_space<vmem>>, vector<1x2x8x128xf32>
      tpu.vector_store %arg9[%c0_9, %c0_10, %c0_11, %c0_12], %20 {strides = array<i32>} : memref<1x2x8x128xf32, #tpu.memory_space<vmem>>, vector<1x2x8x128xf32>,
    } else {
    }
    %5 = arith.index_cast %arg0 : i32 to index
    %6 = memref.load %arg3[%5] : memref<4xi32, #tpu.memory_space<smem>>
    %c0_i32_1 = arith.constant 0 : i32
    %7 = arith.cmpi ne, %6, %c0_i32_1 : i32
    %8 = arith.extui %7 : i1 to i32
    %c0_i32_2 = arith.constant 0 : i32
    %9 = arith.cmpi ne, %8, %c0_i32_2 : i32
    scf.if %9 {
      %15 = arith.index_cast %arg0 : i32 to index
      %16 = memref.load %arg6[%15] : memref<4xf32, #tpu.memory_space<smem>>
      %17 = arith.index_cast %arg0 : i32 to index
      %18 = memref.load %arg7[%17] : memref<4xf32, #tpu.memory_space<smem>>
      %c0 = arith.constant 0 : index
      %c0_6 = arith.constant 0 : index
      %c0_7 = arith.constant 0 : index
      %c0_8 = arith.constant 0 : index
      %19 = vector.load %arg8[%c0, %c0_6, %c0_7, %c0_8] : memref<1x2x8x128xf32, #tpu.memory_space<vmem>>, vector<1x1x8x128xf32>
      %20 = vector.shape_cast %19 : vector<1x1x8x128xf32> to vector<8x128xf32>
      %c0_9 = arith.constant 0 : index
      %c1 = arith.constant 1 : index
      %c0_10 = arith.constant 0 : index
      %c0_11 = arith.constant 0 : index
      %21 = vector.load %arg8[%c0_9, %c1, %c0_10, %c0_11] : memref<1x2x8x128xf32, #tpu.memory_space<vmem>>, vector<1x1x8x128xf32>
      %22 = vector.shape_cast %21 : vector<1x1x8x128xf32> to vector<8x128xf32>
      %23 = vector.broadcast %16 : f32 to vector<8x128xf32>
      %24 = arith.mulf %23, %20 : vector<8x128xf32>
      %25 = vector.broadcast %18 : f32 to vector<8x128xf32>
      %26 = arith.mulf %25, %22 : vector<8x128xf32>
      %27 = arith.addf %24, %26 : vector<8x128xf32>
      %c0_12 = arith.constant 0 : index
      %c0_13 = arith.constant 0 : index
      %c0_14 = arith.constant 0 : index
      %c0_15 = arith.constant 0 : index
      %28 = vector.load %arg9[%c0_12, %c0_13, %c0_14, %c0_15] : memref<1x2x8x128xf32, #tpu.memory_space<vmem>>, vector<1x1x8x128xf32>
      %29 = vector.shape_cast %28 : vector<1x1x8x128xf32> to vector<8x128xf32>
      %30 = vector.shape_cast %27 : vector<8x128xf32> to vector<1x1x8x128xf32>
      tpu.vector_store %arg9[%c0_12, %c0_13, %c0_14, %c0_15], %30 {strides = array<i32>} : memref<1x2x8x128xf32, #tpu.memory_space<vmem>>, vector<1x1x8x128xf32>,
      %31 = vector.broadcast %16 : f32 to vector<8x128xf32>
      %32 = arith.mulf %31, %22 : vector<8x128xf32>
      %33 = vector.broadcast %18 : f32 to vector<8x128xf32>
      %34 = arith.mulf %33, %20 : vector<8x128xf32>
      %35 = arith.addf %32, %34 : vector<8x128xf32>
      %c0_16 = arith.constant 0 : index
      %c1_17 = arith.constant 1 : index
      %c0_18 = arith.constant 0 : index
      %c0_19 = arith.constant 0 : index
      %36 = vector.load %arg9[%c0_16, %c1_17, %c0_18, %c0_19] : memref<1x2x8x128xf32, #tpu.memory_space<vmem>>, vector<1x1x8x128xf32>
      %37 = vector.shape_cast %36 : vector<1x1x8x128xf32> to vector<8x128xf32>
      %38 = vector.shape_cast %35 : vector<8x128xf32> to vector<1x1x8x128xf32>
      tpu.vector_store %arg9[%c0_16, %c1_17, %c0_18, %c0_19], %38 {strides = array<i32>} : memref<1x2x8x128xf32, #tpu.memory_space<vmem>>, vector<1x1x8x128xf32>,
    } else {
    }
    %c0_i32_3 = arith.constant 0 : i32
    %10 = arith.cmpi eq, %1, %c0_i32_3 : i32
    %c0_i32_4 = arith.constant 0 : i32
    %11 = arith.cmpi eq, %6, %c0_i32_4 : i32
    %12 = arith.andi %10, %11 : i1
    %13 = arith.extui %12 : i1 to i32
    %c0_i32_5 = arith.constant 0 : i32
    %14 = arith.cmpi ne, %13, %c0_i32_5 : i32
    scf.if %14 {
      %15 = arith.index_cast %arg0 : i32 to index
      %16 = memref.load %arg4[%15] : memref<4xf32, #tpu.memory_space<smem>>
      %17 = arith.index_cast %arg0 : i32 to index
      %18 = memref.load %arg5[%17] : memref<4xf32, #tpu.memory_space<smem>>
      %c0 = arith.constant 0 : index
      %c0_6 = arith.constant 0 : index
      %c0_7 = arith.constant 0 : index
      %c0_8 = arith.constant 0 : index
      %19 = vector.load %arg8[%c0, %c0_6, %c0_7, %c0_8] : memref<1x2x8x128xf32, #tpu.memory_space<vmem>>, vector<1x2x8x128xf32>
      %20 = vector.broadcast %16 : f32 to vector<1x2x8x128xf32>
      %21 = arith.mulf %19, %20 : vector<1x2x8x128xf32>
      %cst = arith.constant 0.000000e+00 : f32
      %22 = arith.subf %cst, %18 : f32
      %23 = vector.broadcast %22 : f32 to vector<1x2x8x128xf32>
      %24 = arith.maximumf %23, %21 : vector<1x2x8x128xf32>
      %25 = vector.broadcast %18 : f32 to vector<1x2x8x128xf32>
      %26 = arith.minimumf %25, %24 : vector<1x2x8x128xf32>
      %c0_9 = arith.constant 0 : index
      %c0_10 = arith.constant 0 : index
      %c0_11 = arith.constant 0 : index
      %c0_12 = arith.constant 0 : index
      %27 = vector.load %arg9[%c0_9, %c0_10, %c0_11, %c0_12] : memref<1x2x8x128xf32, #tpu.memory_space<vmem>>, vector<1x2x8x128xf32>
      tpu.vector_store %arg9[%c0_9, %c0_10, %c0_11, %c0_12], %26 {strides = array<i32>} : memref<1x2x8x128xf32, #tpu.memory_space<vmem>>, vector<1x2x8x128xf32>,
    } else {
    }
    return
  }
  func.func @transform_0(%arg0: i32, %arg1: i32, %arg2: memref<4xi32, #tpu.memory_space<smem>>, %arg3: memref<4xi32, #tpu.memory_space<smem>>, %arg4: memref<4xf32, #tpu.memory_space<smem>>, %arg5: memref<4xf32, #tpu.memory_space<smem>>, %arg6: memref<4xf32, #tpu.memory_space<smem>>, %arg7: memref<4xf32, #tpu.memory_space<smem>>) -> (i32, i32, i32, i32) {
    %c0_i32 = arith.constant 0 : i32
    %c0_i32_0 = arith.constant 0 : i32
    %c0_i32_1 = arith.constant 0 : i32
    return %arg0, %c0_i32, %arg1, %c0_i32_0 : i32, i32, i32, i32
  }
  func.func @transform_1(%arg0: i32, %arg1: i32, %arg2: memref<4xi32, #tpu.memory_space<smem>>, %arg3: memref<4xi32, #tpu.memory_space<smem>>, %arg4: memref<4xf32, #tpu.memory_space<smem>>, %arg5: memref<4xf32, #tpu.memory_space<smem>>, %arg6: memref<4xf32, #tpu.memory_space<smem>>, %arg7: memref<4xf32, #tpu.memory_space<smem>>) -> (i32, i32, i32, i32) {
    %c0_i32 = arith.constant 0 : i32
    %c0_i32_0 = arith.constant 0 : i32
    %c0_i32_1 = arith.constant 0 : i32
    return %arg0, %c0_i32, %arg1, %c0_i32_0 : i32, i32, i32, i32
  }
}

</mosaic_0001>

<bundles_post_ra>
// kernel: tpu_custom_call.1
= control target key start
LH: loop header
LB: loop body
LE: loop exit
PB: predicated region body
PF: predicated region fallthrough
CT: control target
= control target key end

     0   :  { %s638_s30 = smov [#allocation3]   ;;  %s639_s8 = smov [#allocation4]   ;;  %s857_s0 = inlined_call_operand.vmem [shape: s32[4], index: 0, kind: input, shape index: {}]   ;;  %s858_s6 = inlined_call_operand.hbm [shape: f32[4,2,8,128], index: 6, kind: input, shape index: {}, may-alias: {6,7}]   ;;  %s859_s7 = inlined_call_operand.hbm [shape: f32[4,2,8,128], index: 7, kind: output, shape index: {}, may-alias: {6,7}]   ;;  %s860_s1 = inlined_call_operand.vmem [shape: s32[4], index: 1, kind: input, shape index: {}]   ;;  %s861_s2 = inlined_call_operand.vmem [shape: f32[4], index: 2, kind: input, shape index: {}]   ;;  %s862_s3 = inlined_call_operand.vmem [shape: f32[4], index: 3, kind: input, shape index: {}]   ;;  %s863_s4 = inlined_call_operand.vmem [shape: f32[4], index: 4, kind: input, shape index: {}]   ;;  %s864_s5 = inlined_call_operand.vmem [shape: f32[4], index: 5, kind: input, shape index: {}]  }
   0x1   :  { %s13_s26 = sshll.u32 %s857_s0, 4  ;;  %s18_s29 = sshll.u32 %s860_s1, 4  ;;  %s14_s26 = int_to_ptr.vmem [resolvable:$true] %s13_s26  ;;  %s19_s29 = int_to_ptr.vmem [resolvable:$true] %s18_s29 }
   0x2   :  { %16 = dma.vmem_to_smem %s14_s26, 16, %s638_s30, [#allocation2] }
   0x3   :  { %21 = dma.vmem_to_smem %s19_s29, 16, %s639_s8, [#allocation2] }
   0x4   :  { %s23_s11 = sshll.u32 %s861_s2, 4  ;;  %s28_s14 = sshll.u32 %s862_s3, 4  ;;  %s24_s11 = int_to_ptr.vmem [resolvable:$true] %s23_s11  ;;  %s29_s14 = int_to_ptr.vmem [resolvable:$true] %s28_s14 }
   0x5   :  { %s640_s0 = smov [#allocation5]   ;;  %s641_s15 = smov [#allocation6]  }
   0x6   :  { %26 = dma.vmem_to_smem %s24_s11, 16, %s640_s0, [#allocation2] }
   0x7   :  { %31 = dma.vmem_to_smem %s29_s14, 16, %s641_s15, [#allocation2] }
   0x8   :  { %s33_s17 = sshll.u32 %s863_s4, 4  ;;  %s38_s20 = sshll.u32 %s864_s5, 4  ;;  %s34_s17 = int_to_ptr.vmem [resolvable:$true] %s33_s17  ;;  %s39_s20 = int_to_ptr.vmem [resolvable:$true] %s38_s20 }
   0x9   :  { %s642_s2 = smov [#allocation7]   ;;  %s643_s21 = smov [#allocation8]  }
   0xa   :  { %36 = dma.vmem_to_smem %s34_s17, 16, %s642_s2, [#allocation2] }
   0xb   :  { %41 = dma.vmem_to_smem %s39_s20, 16, %s643_s21, [#allocation2] }
   0xc   :  { %604 = dma.done.wait [#allocation2], 96 }
   0xd   :  { %605 = vsyncadd [#allocation2], 4294967200 }
   0xe   :  { %44 = sfence }
   0xf   :  { %45 = vsyncpa [#allocation10], 0 }
  0x10   :  { %47 = vsyncpa [#allocation10 + $0x1], 0 }
  0x11   :  { %48 = vsyncpa [#allocation11], 0 }
  0x12   :  { %50 = vsyncpa [#allocation11 + $0x1], 0  ;;  %s706_s3 = smov 0   ;;  %s708_s4 = smov 0  }
  0x13   :  { %s710_s22 = smov 0   ;;  %s712_s23 = smov 0  }
  0x14   :  { %s714_s5 = smov 0   ;;  %s716_s24 = smov 0  }
  0x15 LB: > { %s353_s25 = sadd.s32 4294967295, %s636_s24   ;;  %s354_s26 = sadd.s32 4294967294, %s636_s24   ;;  %s636_s24 = sphi %s716_s24, %s56_s24   ;;  %s632_s5 = sphi %s714_s5, %s873_s5   ;;  %s628_s23 = sphi %s712_s23, %s872_s23   ;;  %s624_s22 = sphi %s710_s22, %s871_s22   ;;  %s620_s4 = sphi %s708_s4, %s870_s4   ;;  %s616_s3 = sphi %s706_s3, %s869_s3  }
  0x16   : > { %s68_s27 = sadd.s32 1, %s632_s5  ;;  %s77_s28 = sadd.s32 1, %s624_s22 }
  0x17   : > { %p70_p0 = scmp.ge.s32.totalorder %s68_s27, 4  ;;  %p84_p1 = scmp.ne.s32.totalorder %s624_s22, %s620_s4 }
  0x18   : > { %p85_p2 = scmp.eq.s32.totalorder %s636_s24, 0  ;;  %p90_p3 = scmp.ne.s32.totalorder %s620_s4, %s616_s3 }
  0x19   : > { %s875_s27 = smov (%p70_p0, %s68_s27), 0  ;;  %p91_p5 = scmp.eq.s32.totalorder %s353_s25, 0 }
  0x1a   : > { %p747_p4 = por %p85_p2, %p84_p1  ;;  %s72_s30 = ssub.s32 %s632_s5, %s875_s27 }
  0x1b   : > { %p116_p6 = scmp.eq.s32.totalorder %s353_s25, 3  ;;  %p75_p7 = scmp.eq.s32.totalorder %s72_s30, 0 }
  0x1c   : > { %p753_p8 = por %p91_p5, %p90_p3  ;;  %p122_p10 = scmp.eq.s32.totalorder %s354_s26, 3 }
  0x1d   : > { %p757_p9 = por %p116_p6, %p84_p1  ;;  %p386_p12 = scmp.lt.s32.totalorder %s636_s24, 4 }
  0x1e   : > { %s762_s10 = scalar_select %p75_p7, %s624_s22, %s77_s28  }
  0x1f   : > { %p764_p11 = por %p122_p10, %p90_p3  ;;  %s142_s12 = sand.u32 1, %s624_s22  }
  0x20   : > { %s357_s13 = sshll.u32 %s142_s12, 4  ;;  %s372_s14 = sshll.u32 %s632_s5, 4 }
  0x21   : > { %s152_s1 = scalar_lea.hbm %s858_s6, %s372_s14  ;;  %s146_s16 = scalar_lea.vmem [#allocation9], %s357_s13 }
  0x22   : > { %s155_s17 = sshll.u32 %s146_s16, 4  ;;  %s153_s18 = sshll.u32 %s152_s1, 4  ;;  %s156_s17 = int_to_ptr.vmem [resolvable:$true] %s155_s17  ;;  %s154_s18 = int_to_ptr.hbm [resolvable:$true] %s153_s18 }
  0x23   : > { %p379_p13 = pnand %p386_p12, %p747_p4  ;;  %p360_p0 = scmp.ge.s32.totalorder %s636_s24, 1 }
  0x24   : > { %s143_s19 = scalar_lea.sflag [#allocation10], %s142_s12  ;;  %s644_s20 = smov 128  }
  0x25   : > { %s645_s2 = smov 8   ;;  %p163_p1 = scmp.lt.s32.totalorder %s636_s24, 5 }
  0x26   : > { %381 = dma.hbm_to_vmem [thread:$0]  (!%p379_p13), %s154_s18, 256, %s156_s17, %s143_s19, %s644_s20, %s644_s20, %s645_s2  }
  0x27   : > { %p164_p2 = pnand %p360_p0, %p163_p1 }
  0x28   : > { %s779_s21 = sand.u32 (!%p164_p2), 1, %s620_s4  }
  0x29   : > { %167 = sbr.rel (%p164_p2) target bundleno = 126 (0x7e), region = 24  ;;  %s361_s25 = sshll.u32 (!%p164_p2), %s779_s21, 4 }
  0x2a   : > { %s170_s26 = scalar_lea.sflag (!%p164_p2), [#allocation10], %s779_s21  ;;  %s783_s28 = scalar_lea.vmem (!%p164_p2), [#allocation9], %s361_s25 }
  0x2e   : > { %607 = dma.done.wait (%p753_p8), %s170_s26, 256  }
  0x2f   : > { %609 = vsyncadd (%p753_p8), %s170_s26, 4294967040  ;;  %s790_s29 = sld [smem:[#allocation3 + %s628_s23]]  ;;  %s792_s30 = scalar_lea.vmem [#allocation12], %s361_s25 }
  0x35   : > { %p363_p3 = scmp.eq.s32.totalorder %s790_s29, 0 }
  0x36   : > { %s198_s12 = sld [smem:[#allocation5 + %s628_s23]] (!%p363_p3) }
  0x37   : > { %197 = sbr.rel (%p363_p3) target bundleno = 72 (0x48), region = 32 }
  0x3c   : > { %v199_v0 = vld [vmem:[%s783_s28] sm:$0xff]  ;;  %v200_v1 = vld [vmem:[%s783_s28 + $0x8] sm:$0xff]  ;;  %v201_v2 = vstv %s198_s12 }
  0x3d   : > { %v202_v3 = vmul.f32 %v201_v2, %v199_v0  ;;  %v203_v4 = vmul.f32 %v201_v2, %v200_v1 }
  0x3f   : > { %446 = vtanh.f32 %v202_v3 }
  0x40   : > { %448 = vtanh.f32 %v203_v4 }
  0x45   : > { %v447_v5 = vpop.eup %446 }
  0x46   : > { %v449_v6 = vpop.eup %448  ;;  %206 = vst [vmem:[%s792_s30] sm:$0xff] %v447_v5 }
  0x47   : > { %207 = vst [vmem:[%s792_s30 + $0x8] sm:$0xff] %v449_v6 }
  0x48 PF: > { %s208_s8 = sld [smem:[#allocation4 + %s628_s23]] }
  0x4e   : > { %p364_p4 = scmp.eq.s32.totalorder %s208_s8, 0 }
  0x4f   : > { %s213_s13 = sld [smem:[#allocation7 + %s628_s23]] (!%p364_p4) }
  0x50   : > { %212 = sbr.rel (%p364_p4) target bundleno = 93 (0x5d), region = 36  ;;  %s214_s14 = sld [smem:[#allocation8 + %s628_s23]] (!%p364_p4) }
  0x55   : > { %v215_v7 = vld [vmem:[%s783_s28] sm:$0xff]  ;;  %v365_v8 = vld [vmem:[%s783_s28 + $0x8] sm:$0xff]  ;;  %v218_v9 = vstv %s213_s13 }
  0x56   : > { %v219_v10 = vmul.f32 %v218_v9, %v215_v7  ;;  %v220_v11 = vstv %s214_s14  ;;  %v224_v12 = vmul.f32 %v365_v8, %v218_v9 }
  0x57   : > { %v221_v13 = vmul.f32 %v365_v8, %v220_v11  ;;  %v225_v14 = vmul.f32 %v220_v11, %v215_v7 }
  0x59   : > { %v222_v15 = vadd.f32 %v221_v13, %v219_v10  ;;  %v226_v16 = vadd.f32 %v225_v14, %v224_v12 }
  0x5b   : > { %223 = vst [vmem:[%s792_s30] sm:$0xff] %v222_v15 }
  0x5c   : > { %366 = vst [vmem:[%s792_s30 + $0x8] sm:$0xff] %v226_v16 }
  0x5d PF: > { %p231_p5 = pnand %p364_p4, %p363_p3 }
  0x5e   : > { %s235_s0 = sld [smem:[#allocation5 + %s628_s23]] (!%p231_p5) }
  0x5f   : > { %234 = sbr.rel (%p231_p5) target bundleno = 110 (0x6e), region = 40  ;;  %s236_s15 = sld [smem:[#allocation6 + %s628_s23]] (!%p231_p5) }
  0x64   : > { %v237_v17 = vld [vmem:[%s783_s28] sm:$0xff]  ;;  %v238_v18 = vld [vmem:[%s783_s28 + $0x8] sm:$0xff]  ;;  %v239_v19 = vstv %s235_s0 }
  0x65   : > { %v240_v20 = vmul.f32 %v239_v19, %v237_v17  ;;  %s242_s1 = ssub.f32 0.0, %s236_s15  ;;  %v241_v21 = vmul.f32 %v239_v19, %v238_v18  ;;  %v246_v23 = vstv %s236_s15 }
  0x67   : > { %v243_v22 = vstv %s242_s1 }
  0x68   : > { %v244_v24 = vmax.f32 %v243_v22, %v240_v20  ;;  %v245_v25 = vmax.f32 %v243_v22, %v241_v21 }
  0x6a   : > { %v247_v26 = vmin.f32 %v246_v23, %v244_v24  ;;  %v248_v27 = vmin.f32 %v246_v23, %v245_v25 }
  0x6c   : > { %249 = vst [vmem:[%s792_s30] sm:$0xff] %v247_v26 }
  0x6d   : > { %250 = vst [vmem:[%s792_s30 + $0x8] sm:$0xff] %v248_v27 }
  0x6e PF: > { %s373_s16 = sshll.u32 %s628_s23, 4  ;;  %s265_s20 = sshll.u32 %s792_s30, 4  ;;  %s266_s20 = int_to_ptr.vmem [resolvable:$true] %s265_s20 }
  0x6f   : > { %s264_s19 = scalar_lea.hbm %s859_s7, %s373_s16  ;;  %s252_s25 = scalar_lea.sflag [#allocation11], %s779_s21 }
  0x70   : > { %s267_s2 = sshll.u32 %s264_s19, 4  ;;  %s572_s23 = scalar_lea.hbm %s859_s7, 64  ;;  %s268_s2 = int_to_ptr.hbm [resolvable:$true] %s267_s2 }
  0x71   : > { %s566_s26 = sshra.s32 %s268_s2, 4  ;;  %s567_s26 = int_to_ptr.hbm [resolvable:$true] %s566_s26 }
  0x72   : > { %s568_s28 = scalar_lea.hbm %s567_s26, 16  ;;  %p573_p10 = scmp.lt.s32.totalorder %s567_s26, %s859_s7 }
  0x73   : > { %p569_p6 = scmp.ne.s32.totalorder %s567_s26, %s568_s28  ;;  %p574_p12 = scmp.lt.s32.totalorder %s572_s23, %s568_s28 }
  0x75   : > { %p570_p7 = pnand %p569_p6, %p757_p9  ;;  %p575_p13 = por %p574_p12, %p573_p10 }
  0x77   : > { %p571_p8 = pneg %p570_p7 }
  0x79   : > { %p576_p0 = pnand %p575_p13, %p571_p8 }
  0x7b   : > { %579 = shalt.err (!%p576_p0)
}
  0x7c   : > { %s646_s21 = smov 128   ;;  %s647_s30 = smov 8  }
  0x7d   : > { %376 = dma.vmem_to_hbm [thread:$0]  (%p757_p9), %s266_s20, 256, %s268_s2, %s252_s25, %s646_s21, %s646_s21, %s647_s30  }
  0x7e PF: > { %p387_p1 = scmp.ge.s32.totalorder %s636_s24, 2  ;;  %s282_s14 = sand.u32 1, %s616_s3  }
  0x7f   : > { %s283_s0 = scalar_lea.sflag [#allocation11], %s282_s14 }
  0x80   : > { %p383_p2 = pnand %p387_p1, %p764_p11 }
  0x82   : > { %p384_p3 = pneg %p383_p2 }
  0x84   : > { %611 = dma.done.wait (%p384_p3), %s283_s0, 256  }
  0x85   : > { %613 = vsyncadd (%p384_p3), %s283_s0, 4294967040  ;;  %s56_s24 = sadd.s32 1, %s636_s24   ;;  %s869_s3 = smov %s620_s4 }
  0x86   : > { %p53_p4 = scmp.ge.s32.totalorder %s56_s24, 6   ;;  %s870_s4 = smov %s624_s22 }
  0x87   : > { %s871_s22 = smov %s762_s10  ;;  %s872_s23 = smov %s632_s5 }
  0x88   : > { %s873_s5 = smov %s875_s27  ;;  %55 = sbr.rel (!%p53_p4) target bundleno = 21 (0x15), region = 83 }
  0x8d   :  { %289 = vsyncpa [#allocation10], 1 }
  0x8e   :  { %291 = vsyncpa [#allocation10 + $0x1], 1 }
  0x8f   :  { %292 = vsyncpa [#allocation11], 1 }
  0x90   :  { %294 = vsyncpa [#allocation11 + $0x1], 1 }

</bundles_post_ra>
